<compile_context>
chip_gen: v6e
topology: v6e:2x2x1
jax: 0.10.0
libtpu: 0.0.40
codegen_flags: <defaults>
</compile_context>

<pallas_src>
import jax
import jax.numpy as jnp
from jax.experimental import pallas as pl
from jax.experimental.pallas import tpu as pltpu


def make_fused_gat_kernel(dims_in, hidden_dim):
    """Kernel closure: all layers of the GAT forward in one body.

    dims_in: static tuple of per-layer input dims (for static slab slicing).
    """
    H = hidden_dim

    def kernel(x_ref, adj_ref, p_ref, out_ref):
        # Additive mask bias hoisted out of the layer loop (one select total).
        mask_bias = jnp.where(adj_ref[...] > 0.0,
                              jnp.float32(0.0), jnp.float32(-1e30))

        h = x_ref[...]
        row = 0
        for din in dims_in:                         # static unroll over layers
            wp = p_ref[row:row + din, :]            # (din, H+2)  [W | W@A]
            bp = p_ref[row + din:row + din + 1, :]  # (1,   H+2)  [b | b@A(+b_att)]
            row += din + 1

            # One MXU pass: cols [:H] -> h, [H] -> s_src, [H+1] -> s_dst+b_att.
            y = jnp.dot(h, wp, preferred_element_type=jnp.float32) + bp
            hn = y[:, :H]
            s_src = y[:, H:H + 1]                   # (N, 1)
            s_dst = y[:, H + 1:H + 2]               # (N, 1), b_att folded in

            # e[dst, src] = leaky_relu(s_src[src] + s_dst[dst] + b_att)
            # (the (N,1)->(1,N) relayout of s_src is negligible at this size;
            #  it is the only cross-lane move left on the per-layer chain)
            e = s_dst + s_src.T                     # (N, N)
            e = jnp.where(e > 0, e, 0.01 * e)       # leaky_relu, slope 0.01
            e = e + mask_bias                       # masked entries -> ~-1e30

            # Masked softmax over incoming edges (src axis = 1).
            # exp(~-1e30 - m) underflows to exactly 0; self-loops => denom >= 1.
            m = jnp.max(e, axis=1, keepdims=True)
            p = jnp.exp(e - m)
            denom = jnp.sum(p, axis=1, keepdims=True)

            # Aggregate then normalize on the small (N, H) result.
            agg = jnp.dot(p, hn, preferred_element_type=jnp.float32)
            agg = agg * pl.reciprocal(denom, approx=True)

            # GAT.forward applies ReLU after every layer.
            h = jnp.maximum(agg, 0.0)

        out_ref[...] = h

    return kernel


def pack_gat_params(params, b_atts, hidden_dim):
    """Fold the attention projection + bias into the node linear and stack all
    layers into one flat (sum(din_l + 1), H+2) f32 slab -> single DMA."""
    hp = jax.lax.Precision.HIGHEST
    rows = []
    for li, (w, b, a) in enumerate(params):
        wp = jnp.concatenate([w, jnp.dot(w, a, precision=hp)], axis=1)  # (din, H+2)
        bp = jnp.concatenate([b, jnp.dot(b, a, precision=hp)], axis=1)  # (1,   H+2)
        bp = bp.at[0, hidden_dim + 1].add(b_atts[li])   # fold b_att into s_dst
        rows.append(wp)
        rows.append(bp)
    return jnp.concatenate(rows, axis=0)


def gat_forward(x, params, adj, b_atts):
    """Fused multi-layer GAT forward: a single pallas_call with 3 inputs."""
    N, in_dim = x.shape
    hidden = params[0][0].shape[1]
    num_layers = len(params)
    dims_in = tuple([in_dim] + [hidden] * (num_layers - 1))

    slab = pack_gat_params(params, b_atts, hidden)

    # Advisory cost estimate for XLA's scheduler.
    flops = 0
    for din in dims_in:
        flops += 2 * N * din * (hidden + 2)      # packed node linear
        flops += 2 * N * N * hidden              # aggregation p @ h
        flops += 8 * N * N                       # leaky_relu / mask / softmax VPU
    transcendentals = num_layers * (N * N + N)   # exp + reciprocal
    bytes_accessed = 4 * (x.size + adj.size + slab.size + N * hidden)

    vmem = pl.BlockSpec(memory_space=pltpu.MemorySpace.VMEM)

    # Grid-less on purpose: whole problem fits one TC's VMEM.  For batched
    # graphs / large N, add a "parallel" batch or dst-row-block grid axis.
    return pl.pallas_call(
        make_fused_gat_kernel(dims_in, hidden),
        out_shape=jax.ShapeDtypeStruct((N, hidden), jnp.float32),
        in_specs=[vmem, vmem, vmem],
        out_specs=vmem,
        cost_estimate=pl.CostEstimate(flops=flops,
                                      transcendentals=transcendentals,
                                      bytes_accessed=bytes_accessed),
    )(x, adj, slab)


# ---------------------------------------------------------------------------
# parameter init (mirrors torch.nn.Linear's uniform init, deterministic)
# ---------------------------------------------------------------------------
def init_linear(key, fan_in, fan_out):
    kw, kb = jax.random.split(key)
    bound = 1.0 / jnp.sqrt(jnp.float32(fan_in))
    w = jax.random.uniform(kw, (fan_in, fan_out), jnp.float32, -bound, bound)
    b = jax.random.uniform(kb, (1, fan_out), jnp.float32, -bound, bound)
    return w, b


def init_gat_params(key, input_dim, hidden_dim, num_layers):
    """Per layer: W (Din, H), b (1, H), A (H, 2) = [a_src | a_dst]; b_att scalar."""
    params = []
    b_atts = []
    dims_in = [input_dim] + [hidden_dim] * (num_layers - 1)
    for li in range(num_layers):
        key, k1, k2 = jax.random.split(key, 3)
        w, b = init_linear(k1, dims_in[li], hidden_dim)
        # attention = Linear(2*hidden, 1) applied to cat([h_src, h_dst])
        aw, ab = init_linear(k2, 2 * hidden_dim, 1)
        a = jnp.concatenate([aw[:hidden_dim, :], aw[hidden_dim:, :]], axis=1)  # (H, 2)
        params.append((w, b, a))
        b_atts.append(ab.reshape(()))
    return params, jnp.stack(b_atts)  # b_atts: (num_layers,)


# ---------------------------------------------------------------------------
# pure-JAX reference (faithful to the original un-fused math)
# ---------------------------------------------------------------------------
def gat_forward_ref(x, params, adj, b_atts):
    hp = jax.lax.Precision.HIGHEST
    mask = adj > 0.0
    h = x
    for li, (w, b, a) in enumerate(params):
        h = jnp.dot(h, w, precision=hp) + b
        scores = jnp.dot(h, a, precision=hp)
        e = scores[:, 1:2] + scores[:, 0:1].T + b_atts[li]
        e = jnp.where(e > 0, e, 0.01 * e)
        e = jnp.where(mask, e, -1e30)
        alpha = jax.nn.softmax(e, axis=1)
        h = jnp.maximum(jnp.dot(alpha, h, precision=hp), 0.0)
    return h


if __name__ == "__main__":
    N = 16          # number of graph nodes
    IN_DIM = 16     # input feature dim
    HID = 8         # GAT hidden dim (fixed to 8 in the PyTorch module)
    LAYERS = 2

    root = jax.random.PRNGKey(0)
    k_x, k_adj, k_p = jax.random.split(root, 3)

    # node features
    x = jax.random.normal(k_x, (N, IN_DIM), jnp.float32)

    # deterministic random graph with guaranteed self-loops (in-degree >= 1)
    adj = (jax.random.uniform(k_adj, (N, N)) < 0.3).astype(jnp.float32)
    adj = jnp.maximum(adj, jnp.eye(N, dtype=jnp.float32))   # adj[dst, src]

    params, b_atts = init_gat_params(k_p, IN_DIM, HID, LAYERS)

    out = gat_forward(x, params, adj, b_atts)
    out = jax.block_until_ready(out)
    assert out.shape == (N, HID) and out.dtype == jnp.float32

    ref = gat_forward_ref(x, params, adj, b_atts)
    assert bool(jnp.allclose(out, ref, atol=2e-2, rtol=2e-2)), \
        "Pallas GAT output mismatch vs JAX reference"

    print("KERNEL_OK")
</pallas_src>

<mosaic_0001>
module attributes {stable_mosaic.version = 11 : i64} {
  func.func @kernel(%arg0: memref<16x16xf32, #tpu.memory_space<vmem>>, %arg1: memref<16x16xf32, #tpu.memory_space<vmem>>, %arg2: memref<26x10xf32, #tpu.memory_space<vmem>>, %arg3: memref<16x8xf32, #tpu.memory_space<vmem>>) attributes {dimension_semantics = [], scalar_prefetch = 0 : i64, scratch_operands = 0 : i64, tpu.core_type = #tpu.core_type<tc>} {
    %c0 = arith.constant 0 : index
    %c0_0 = arith.constant 0 : index
    %0 = vector.load %arg1[%c0, %c0_0] : memref<16x16xf32, #tpu.memory_space<vmem>>, vector<16x16xf32>
    %cst = arith.constant 0.000000e+00 : f32
    %1 = vector.broadcast %cst : f32 to vector<16x16xf32>
    %2 = arith.cmpf ogt, %0, %1 : vector<16x16xf32>
    %cst_1 = arith.constant 0.000000e+00 : f32
    %cst_2 = arith.constant -1.000000e+30 : f32
    %3 = vector.broadcast %cst_1 : f32 to vector<16x16xf32>
    %4 = vector.broadcast %cst_2 : f32 to vector<16x16xf32>
    %5 = arith.select %2, %3, %4 : vector<16x16xi1>, vector<16x16xf32>
    %c0_3 = arith.constant 0 : index
    %c0_4 = arith.constant 0 : index
    %6 = vector.load %arg0[%c0_3, %c0_4] : memref<16x16xf32, #tpu.memory_space<vmem>>, vector<16x16xf32>
    %c0_5 = arith.constant 0 : index
    %c0_6 = arith.constant 0 : index
    %7 = vector.load %arg2[%c0_5, %c0_6] : memref<26x10xf32, #tpu.memory_space<vmem>>, vector<16x10xf32>
    %c16 = arith.constant 16 : index
    %c0_7 = arith.constant 0 : index
    %8 = vector.load %arg2[%c16, %c0_7] : memref<26x10xf32, #tpu.memory_space<vmem>>, vector<1x10xf32>
    %cst_8 = arith.constant dense<0.000000e+00> : vector<16x10xf32>
    %9 = tpu.matmul %6, %7, %cst_8 {dimension_numbers = #tpu.dot_dimension_numbers<[1], [0], [0], [1], [0, 0, 1, 1], [], []>} : vector<16x16xf32>, vector<16x10xf32>, vector<16x10xf32> -> vector<16x10xf32>
    %10 = vector.broadcast %8 : vector<1x10xf32> to vector<16x10xf32>
    %11 = arith.addf %9, %10 : vector<16x10xf32>
    %12 = vector.extract_strided_slice %11 {offsets = [0, 0], sizes = [16, 8], strides = [1, 1]} : vector<16x10xf32> to vector<16x8xf32>
    %13 = vector.extract_strided_slice %11 {offsets = [0, 8], sizes = [16, 1], strides = [1, 1]} : vector<16x10xf32> to vector<16x1xf32>
    %14 = vector.extract_strided_slice %11 {offsets = [0, 9], sizes = [16, 1], strides = [1, 1]} : vector<16x10xf32> to vector<16x1xf32>
    %15 = tpu.transpose %13, [1, 0] : vector<16x1xf32> -> vector<1x16xf32>
    %16 = vector.broadcast %14 : vector<16x1xf32> to vector<16x16xf32>
    %17 = vector.broadcast %15 : vector<1x16xf32> to vector<16x16xf32>
    %18 = arith.addf %16, %17 : vector<16x16xf32>
    %cst_9 = arith.constant 0.000000e+00 : f32
    %19 = vector.broadcast %cst_9 : f32 to vector<16x16xf32>
    %20 = arith.cmpf ogt, %18, %19 : vector<16x16xf32>
    %cst_10 = arith.constant 0.00999999977 : f32
    %21 = vector.broadcast %cst_10 : f32 to vector<16x16xf32>
    %22 = arith.mulf %21, %18 : vector<16x16xf32>
    %23 = arith.select %20, %18, %22 : vector<16x16xi1>, vector<16x16xf32>
    %24 = arith.addf %23, %5 : vector<16x16xf32>
    %cst_11 = arith.constant dense<0xFF800000> : vector<16xf32>
    %25 = vector.multi_reduction <maximumf>, %24, %cst_11 [1] : vector<16x16xf32> to vector<16xf32>
    %26 = vector.shape_cast %25 : vector<16xf32> to vector<16x1xf32>
    %27 = vector.broadcast %26 : vector<16x1xf32> to vector<16x16xf32>
    %28 = arith.subf %24, %27 : vector<16x16xf32>
    %29 = math.exp %28 : vector<16x16xf32>
    %cst_12 = arith.constant dense<0.000000e+00> : vector<16xf32>
    %30 = vector.multi_reduction <add>, %29, %cst_12 [1] : vector<16x16xf32> to vector<16xf32>
    %31 = vector.shape_cast %30 : vector<16xf32> to vector<16x1xf32>
    %cst_13 = arith.constant dense<0.000000e+00> : vector<16x8xf32>
    %32 = tpu.matmul %29, %12, %cst_13 {dimension_numbers = #tpu.dot_dimension_numbers<[1], [0], [0], [1], [0, 0, 1, 1], [], []>} : vector<16x16xf32>, vector<16x8xf32>, vector<16x8xf32> -> vector<16x8xf32>
    %33 = tpu.reciprocal %31 {approx = true} : vector<16x1xf32> -> vector<16x1xf32>
    %34 = vector.broadcast %33 : vector<16x1xf32> to vector<16x8xf32>
    %35 = arith.mulf %32, %34 : vector<16x8xf32>
    %cst_14 = arith.constant 0.000000e+00 : f32
    %36 = vector.broadcast %cst_14 : f32 to vector<16x8xf32>
    %37 = arith.maximumf %35, %36 : vector<16x8xf32>
    %c17 = arith.constant 17 : index
    %c0_15 = arith.constant 0 : index
    %38 = vector.load %arg2[%c17, %c0_15] : memref<26x10xf32, #tpu.memory_space<vmem>>, vector<8x10xf32>
    %c25 = arith.constant 25 : index
    %c0_16 = arith.constant 0 : index
    %39 = vector.load %arg2[%c25, %c0_16] : memref<26x10xf32, #tpu.memory_space<vmem>>, vector<1x10xf32>
    %cst_17 = arith.constant dense<0.000000e+00> : vector<16x10xf32>
    %40 = tpu.matmul %37, %38, %cst_17 {dimension_numbers = #tpu.dot_dimension_numbers<[1], [0], [0], [1], [0, 0, 1, 1], [], []>} : vector<16x8xf32>, vector<8x10xf32>, vector<16x10xf32> -> vector<16x10xf32>
    %41 = vector.broadcast %39 : vector<1x10xf32> to vector<16x10xf32>
    %42 = arith.addf %40, %41 : vector<16x10xf32>
    %43 = vector.extract_strided_slice %42 {offsets = [0, 0], sizes = [16, 8], strides = [1, 1]} : vector<16x10xf32> to vector<16x8xf32>
    %44 = vector.extract_strided_slice %42 {offsets = [0, 8], sizes = [16, 1], strides = [1, 1]} : vector<16x10xf32> to vector<16x1xf32>
    %45 = vector.extract_strided_slice %42 {offsets = [0, 9], sizes = [16, 1], strides = [1, 1]} : vector<16x10xf32> to vector<16x1xf32>
    %46 = tpu.transpose %44, [1, 0] : vector<16x1xf32> -> vector<1x16xf32>
    %47 = vector.broadcast %45 : vector<16x1xf32> to vector<16x16xf32>
    %48 = vector.broadcast %46 : vector<1x16xf32> to vector<16x16xf32>
    %49 = arith.addf %47, %48 : vector<16x16xf32>
    %cst_18 = arith.constant 0.000000e+00 : f32
    %50 = vector.broadcast %cst_18 : f32 to vector<16x16xf32>
    %51 = arith.cmpf ogt, %49, %50 : vector<16x16xf32>
    %cst_19 = arith.constant 0.00999999977 : f32
    %52 = vector.broadcast %cst_19 : f32 to vector<16x16xf32>
    %53 = arith.mulf %52, %49 : vector<16x16xf32>
    %54 = arith.select %51, %49, %53 : vector<16x16xi1>, vector<16x16xf32>
    %55 = arith.addf %54, %5 : vector<16x16xf32>
    %cst_20 = arith.constant dense<0xFF800000> : vector<16xf32>
    %56 = vector.multi_reduction <maximumf>, %55, %cst_20 [1] : vector<16x16xf32> to vector<16xf32>
    %57 = vector.shape_cast %56 : vector<16xf32> to vector<16x1xf32>
    %58 = vector.broadcast %57 : vector<16x1xf32> to vector<16x16xf32>
    %59 = arith.subf %55, %58 : vector<16x16xf32>
    %60 = math.exp %59 : vector<16x16xf32>
    %cst_21 = arith.constant dense<0.000000e+00> : vector<16xf32>
    %61 = vector.multi_reduction <add>, %60, %cst_21 [1] : vector<16x16xf32> to vector<16xf32>
    %62 = vector.shape_cast %61 : vector<16xf32> to vector<16x1xf32>
    %cst_22 = arith.constant dense<0.000000e+00> : vector<16x8xf32>
    %63 = tpu.matmul %60, %43, %cst_22 {dimension_numbers = #tpu.dot_dimension_numbers<[1], [0], [0], [1], [0, 0, 1, 1], [], []>} : vector<16x16xf32>, vector<16x8xf32>, vector<16x8xf32> -> vector<16x8xf32>
    %64 = tpu.reciprocal %62 {approx = true} : vector<16x1xf32> -> vector<16x1xf32>
    %65 = vector.broadcast %64 : vector<16x1xf32> to vector<16x8xf32>
    %66 = arith.mulf %63, %65 : vector<16x8xf32>
    %cst_23 = arith.constant 0.000000e+00 : f32
    %67 = vector.broadcast %cst_23 : f32 to vector<16x8xf32>
    %68 = arith.maximumf %66, %67 : vector<16x8xf32>
    %c0_24 = arith.constant 0 : index
    %c0_25 = arith.constant 0 : index
    %69 = vector.load %arg3[%c0_24, %c0_25] : memref<16x8xf32, #tpu.memory_space<vmem>>, vector<16x8xf32>
    tpu.vector_store %arg3[%c0_24, %c0_25], %68 {strides = array<i32>} : memref<16x8xf32, #tpu.memory_space<vmem>>, vector<16x8xf32>,
    return
  }
}

</mosaic_0001>

<bundles_post_ra>
// kernel: tpu_custom_call.1
= control target key start
LH: loop header
LB: loop body
LE: loop exit
PB: predicated region body
PF: predicated region fallthrough
CT: control target
= control target key end

     0   :  { %vm29_vm0 = vcmask 130048   ;;  %v612_v4 = vmov 9   ;;  %s613_s22 = smov 120   ;;  %v159_v12 = vlaneseq  ;;  %v614_v23 = vmov -1e+30   ;;  %s705_s2 = inlined_call_operand.vmem [shape: f32[26,10], index: 2, kind: input, shape index: {}]   ;;  %s706_s0 = inlined_call_operand.vmem [shape: f32[16,16], index: 0, kind: input, shape index: {}]   ;;  %s707_s1 = inlined_call_operand.vmem [shape: f32[16,16], index: 1, kind: input, shape index: {}]   ;;  %s708_s3 = inlined_call_operand.vmem [shape: f32[16,8], index: 3, kind: output, shape index: {}]  }
   0x1   :  { %v23_v0 = vld [vmem:[%s705_s2 + $0x8] sm:$0xff]  ;;  %v22_v1 = vld [vmem:[%s705_s2] sm:$0xff]  ;;  %594 = vset.pattern.permute.xlu1 %v612_v4  ;;  %v539_v5 = vld [vmem:[%s705_s2 + $0x10] ss:$0 sm:$0xff]  ;;  %vm284_vm5 = vcmask 64512  }
   0x2   :  { %v20_v2 = vld [vmem:[%s706_s0] sm:$0xff]  ;;  %564 = vmatprep.subr.mxu0 %v23_v0  ;;  %v21_v3 = vld [vmem:[%s706_s0 + $0x8] sm:$0xff]  ;;  %v654_v13 = vshrl.u32 %v159_v12, 7  ;;  %v278_v44 = vld [vmem:[%s705_s2 + $0x11] sm:$0xff] }
   0x3   :  { %568 = vmatprep.mubr.msk.f32.mxu0 %vm29_vm0, %v20_v2  ;;  %565 = vmatpush3.msra.mxu0 %v23_v0  ;;  %v15_v16 = vld [vmem:[%s707_s1 + $0x8] sm:$0xff]  ;;  %v14_v17 = vld [vmem:[%s707_s1] sm:$0xff]  ;;  %v544_v55 = vld [vmem:[%s705_s2 + $0x19] ss:$0 sm:$0xff] }
   0x4   :  { %566 = vmatprep.subr.mxu0 %v22_v1  ;;  %v161_v15 = vsub.s32 0, %v654_v13  ;;  %vm17_vm1 = vcmp.gt.f32.partialorder %v15_v16, 0.0  ;;  %vm16_vm2 = vcmp.gt.f32.partialorder %v14_v17, 0.0 }
   0x5   :  { %567 = vmatpush3.msra.mxu0 %v22_v1  ;;  %v665_v24 = vsel %vm17_vm1, 0.0, %v614_v23  ;;  %v667_v25 = vsel %vm16_vm2, 0.0, %v614_v23 }
   0x6   :  { %569 = vmatmul.mubr.msk.f32.vlgmr.msra.gmra.mxu0 %vm29_vm0, %v21_v3  ;;  %578 = vmatprep.subr.mxu0 %v278_v44 }
   0x7   :  { %579 = vmatpush3.msra.mxu0 %v278_v44 }
  0xc6   :  { %v570_v6 = vpop.f32.mrf.mxu0 }
  0xc7   :  { %v108_v7 = vadd.f32 %v570_v6, %v539_v5 }
  0xc8   :  { %v102_v8 = vpop.f32.mrf.mxu0 }
  0xc9   :  { %v103_v9 = vadd.f32 %v539_v5, %v102_v8  ;;  %571 = vmatprep.subr.mxu1 %v108_v7 }
  0xca   :  { %572 = vmatpush3.msra.mxu1 %v108_v7 }
  0xcb   :  { %152 = vperm.xlu1 %594, %v103_v9   ;;  %113 = vrot.lane.b32.xlu0 %v103_v9, %s613_s22 }
  0xcc   :  { %573 = vmatprep.subr.mxu1 %v103_v9 }
  0xcd   :  { %574 = vmatpush3.msra.mxu1 %v103_v9 }
  0xcf   :  { %156 = vperm.xlu1 %594, %v108_v7   ;;  %115 = vrot.lane.b32.xlu0 %v108_v7, %s613_s22 }
 0x13d   :  { %v114_v10 = vpop.permute.xlu0 %113 }
 0x13e   :  { %119 = vxpose.xlu0.b32.start [1/2] (short) (narrow) %v114_v10, 8 }
 0x141   :  { %v116_v11 = vpop.permute.xlu0 %115 }
 0x142   :  { %120 = vxpose.xlu0.b32.end [2/2] (short) (narrow) %v116_v11, 8 }
 0x146   :  { %v153_v14 = vpop.permute.xlu1 %152 }
 0x14a   :  { %v157_v20 = vpop.permute.xlu1 %156 }
 0x16b   :  { %595 = vset.pattern.permute.xlu0 %v612_v4 }
 0x1ba   :  { %v135_v18 = vpop.trf.xlu0 }
 0x1bb   :  { %v162_v19 = vrot.slane %v135_v18, %v161_v15 }
 0x1bd   :  { %v163_v21 = vadd.f32 %v162_v19, %v153_v14  ;;  %v164_v22 = vadd.f32 %v162_v19, %v157_v20 }
 0x1bf   :  { %v167_v26 = vmul.f32 0.01, %v163_v21  ;;  %v168_v27 = vmul.f32 0.01, %v164_v22  ;;  %vm166_vm3 = vcmp.gt.f32.partialorder %v164_v22, 0.0  ;;  %vm165_vm4 = vcmp.gt.f32.partialorder %v163_v21, 0.0 }
 0x1c1   :  { %v170_v28 = vsel %vm166_vm3, %v164_v22, %v168_v27  ;;  %v169_v29 = vsel %vm165_vm4, %v163_v21, %v167_v26 }
 0x1c2   :  { %v172_v30 = vadd.f32 %v170_v28, %v665_v24  ;;  %v171_v31 = vadd.f32 %v169_v29, %v667_v25 }
 0x1c4   :  { %v176_v32 = vsel %vm29_vm0, %v172_v30, -inf  ;;  %v173_v33 = vsel %vm29_vm0, %v171_v31, -inf }
 0x1c5   :  { %177 = vmax.xlane.f32.xlu0 %v176_v32  ;;  %174 = vmax.xlane.f32.xlu1 %v173_v33 }
 0x24e   :  { %v178_v34 = vpop.xlane.xlu0 %177  ;;  %v175_v35 = vpop.xlane.xlu1 %174 }
 0x24f   :  { %v180_v36 = vsub.f32 %v172_v30, %v178_v34  ;;  %v179_v37 = vsub.f32 %v171_v31, %v175_v35 }
 0x251   :  { %v183_v38 = vmul.f32 1.442695, %v180_v36  ;;  %v181_v39 = vmul.f32 1.442695, %v179_v37 }
 0x253   :  { %596 = vpow2.f32 %v183_v38 }
 0x254   :  { %598 = vpow2.f32 %v181_v39 }
 0x260   :  { %v597_v40 = vpop.eup %596 }
 0x261   :  { %v599_v41 = vpop.eup %598  ;;  %v188_v43 = vsel %vm29_vm0, %v597_v40, 0.0 }
 0x262   :  { %575 = vmatprep.mubr.msk.f32.mxu1 %vm29_vm0, %v599_v41  ;;  %v185_v42 = vsel %vm29_vm0, %v599_v41, 0.0 }
 0x263   :  { %186 = vadd.xlane.f32.xlu1 %v185_v42  ;;  %576 = vmatmul.mubr.msk.f32.vlgmr.msra.gmra.mxu1 %vm29_vm0, %v597_v40 }
 0x267   :  { %189 = vadd.xlane.f32.xlu1 %v188_v43 }
 0x2ec   :  { %v187_v45 = vpop.xlane.xlu1 %186 }
 0x2f0   :  { %v190_v46 = vpop.xlane.xlu1 %189 }
 0x2f1   :  { %600 = vrcp.f32 %v190_v46 }
 0x2f2   :  { %602 = vrcp.f32 %v187_v45 }
 0x2fe   :  { %v601_v48 = vpop.eup %600 }
 0x2ff   :  { %v603_v49 = vpop.eup %602 }
 0x323   :  { %v577_v47 = vpop.f32.mrf.mxu1 }
 0x324   :  { %v275_v50 = vmul.f32 %v601_v48, %v577_v47 }
 0x325   :  { %v263_v51 = vpop.f32.mrf.mxu1 }
 0x326   :  { %v274_v52 = vmul.f32 %v603_v49, %v263_v51  ;;  %v277_v54 = vmax.f32 %v275_v50, 0.0 }
 0x328   :  { %v276_v53 = vmax.f32 %v274_v52, 0.0 }
 0x32a   :  { %580 = vmatprep.mubr.msk.f32.mxu0 %vm284_vm5, %v276_v53 }
 0x32b   :  { %581 = vmatmul.mubr.msk.f32.vlgmr.msra.gmra.mxu0 %vm284_vm5, %v277_v54 }
 0x3eb   :  { %v582_v56 = vpop.f32.mrf.mxu0 }
 0x3ec   :  { %v363_v57 = vadd.f32 %v582_v56, %v544_v55 }
 0x3ed   :  { %v357_v58 = vpop.f32.mrf.mxu0 }
 0x3ee   :  { %v358_v59 = vadd.f32 %v544_v55, %v357_v58  ;;  %583 = vmatprep.subr.mxu1 %v363_v57 }
 0x3ef   :  { %584 = vmatpush3.msra.mxu1 %v363_v57 }
 0x3f0   :  { %368 = vrot.lane.b32.xlu1 %v358_v59, %s613_s22  ;;  %585 = vmatprep.subr.mxu1 %v358_v59 }
 0x3f1   :  { %586 = vmatpush3.msra.mxu1 %v358_v59 }
 0x3f4   :  { %370 = vrot.lane.b32.xlu1 %v363_v57, %s613_s22 }
 0x3f8   :  { %411 = vperm.xlu1 %594, %v363_v57  }
 0x3fc   :  { %407 = vperm.xlu1 %594, %v358_v59  }
 0x462   :  { %v369_v60 = vpop.permute.xlu1 %368 }
 0x463   :  { %374 = vxpose.xlu1.b32.start [1/2] (short) (narrow) %v369_v60, 8 }
 0x466   :  { %v371_v61 = vpop.permute.xlu1 %370 }
 0x467   :  { %375 = vxpose.xlu1.b32.end [2/2] (short) (narrow) %v371_v61, 8 }
 0x473   :  { %v412_v62 = vpop.permute.xlu1 %411 }
 0x477   :  { %v408_v63 = vpop.permute.xlu1 %407 }
 0x4df   :  { %v390_v0 = vpop.trf.xlu1 }
 0x4e0   :  { %v417_v1 = vrot.slane %v390_v0, %v161_v15 }
 0x4e2   :  { %v418_v2 = vadd.f32 %v417_v1, %v408_v63  ;;  %v419_v3 = vadd.f32 %v417_v1, %v412_v62 }
 0x4e4   :  { %v422_v4 = vmul.f32 0.01, %v418_v2  ;;  %v423_v5 = vmul.f32 0.01, %v419_v3  ;;  %vm420_vm6 = vcmp.gt.f32.partialorder %v418_v2, 0.0  ;;  %vm421_vm7 = vcmp.gt.f32.partialorder %v419_v3, 0.0 }
 0x4e6   :  { %v424_v6 = vsel %vm420_vm6, %v418_v2, %v422_v4  ;;  %v425_v7 = vsel %vm421_vm7, %v419_v3, %v423_v5 }
 0x4e7   :  { %v426_v8 = vadd.f32 %v424_v6, %v667_v25  ;;  %v427_v10 = vadd.f32 %v425_v7, %v665_v24 }
 0x4e9   :  { %v428_v9 = vsel %vm29_vm0, %v426_v8, -inf  ;;  %v431_v11 = vsel %vm29_vm0, %v427_v10, -inf }
 0x4ea   :  { %429 = vmax.xlane.f32.xlu0 %v428_v9 }
 0x4ee   :  { %432 = vmax.xlane.f32.xlu0 %v431_v11 }
 0x573   :  { %v430_v12 = vpop.xlane.xlu0 %429 }
 0x574   :  { %v434_v13 = vsub.f32 %v426_v8, %v430_v12 }
 0x576   :  { %v436_v14 = vmul.f32 1.442695, %v434_v13 }
 0x577   :  { %v433_v15 = vpop.xlane.xlu0 %432 }
 0x578   :  { %604 = vpow2.f32 %v436_v14  ;;  %v435_v16 = vsub.f32 %v427_v10, %v433_v15 }
 0x57a   :  { %v438_v17 = vmul.f32 1.442695, %v435_v16 }
 0x57c   :  { %606 = vpow2.f32 %v438_v17 }
 0x585   :  { %v605_v18 = vpop.eup %604 }
 0x586   :  { %587 = vmatprep.mubr.msk.f32.mxu1 %vm29_vm0, %v605_v18  ;;  %v440_v19 = vsel %vm29_vm0, %v605_v18, 0.0 }
 0x587   :  { %441 = vadd.xlane.f32.xlu0 %v440_v19 }
 0x589   :  { %v607_v20 = vpop.eup %606 }
 0x58a   :  { %588 = vmatmul.mubr.msk.f32.vlgmr.msra.gmra.mxu1 %vm29_vm0, %v607_v20  ;;  %v443_v21 = vsel %vm29_vm0, %v607_v20, 0.0 }
 0x58b   :  { %444 = vadd.xlane.f32.xlu0 %v443_v21 }
 0x610   :  { %v442_v22 = vpop.xlane.xlu0 %441 }
 0x614   :  { %v445_v23 = vpop.xlane.xlu0 %444 }
 0x615   :  { %608 = vrcp.f32 %v445_v23 }
 0x616   :  { %610 = vrcp.f32 %v442_v22 }
 0x622   :  { %v609_v24 = vpop.eup %608 }
 0x623   :  { %v611_v27 = vpop.eup %610 }
 0x64a   :  { %v589_v25 = vpop.f32.mrf.mxu1 }
 0x64b   :  { %v530_v26 = vmul.f32 %v609_v24, %v589_v25 }
 0x64c   :  { %v518_v28 = vpop.f32.mrf.mxu1 }
 0x64d   :  { %v532_v29 = vmax.f32 %v530_v26, 0.0  ;;  %v529_v30 = vmul.f32 %v611_v27, %v518_v28 }
 0x64f   :  { %534 = vst.msk [vmem:[%s708_s3 + $0x8] sm:$0xff] %vm284_vm5, %v532_v29  ;;  %v531_v31 = vmax.f32 %v529_v30, 0.0 }
 0x651   :  { %533 = vst.msk [vmem:[%s708_s3] sm:$0xff] %vm284_vm5, %v531_v31 }

</bundles_post_ra>
